<compile_context>
chip_gen: v7x
topology: tpu7x:2x2x1
jax: 0.10.0
libtpu: 0.0.40
codegen_flags: <defaults>
</compile_context>

<pallas_src>
import functools

import jax
import jax.numpy as jnp
from jax import lax
from jax.experimental import pallas as pl
from jax.experimental.pallas import tpu as pltpu

TEMPERATURE = 0.1
BASE_TEMPERATURE = 0.05


def _round_up(x, m):
    return (x + m - 1) // m * m


def _fscl_kernel(feat_r_ref, feat_c_ref, a_col_ref, p_col_ref, a_row_ref,
                 p_row_ref, out_ref, fn_row, exp_acc, lm_acc, pos_acc, *,
                 temperature, m_actual, tm, tn, mm_dtype):
    r = pl.program_id(0)
    c = pl.program_id(1)
    n_c = pl.num_programs(1)
    inv_t = 1.0 / temperature

    # --- per-row-sweep init: zero accumulators, normalize the row tile once ---
    @pl.when(c == 0)
    def _init():
        exp_acc[...] = jnp.zeros_like(exp_acc)
        lm_acc[...] = jnp.zeros_like(lm_acc)
        pos_acc[...] = jnp.zeros_like(pos_acc)
        f = feat_r_ref[...].astype(jnp.float32)
        ssq = jnp.sum(f * f, axis=-1, keepdims=True)
        fn_row[...] = (f * lax.rsqrt(jnp.maximum(ssq, 1e-24))).astype(mm_dtype)

    # --- normalize the column tile (O(TN*D), negligible vs O(TM*TN*D) matmul) ---
    fc = feat_c_ref[...].astype(jnp.float32)
    ssq_c = jnp.sum(fc * fc, axis=-1, keepdims=True)
    fn_c = (fc * lax.rsqrt(jnp.maximum(ssq_c, 1e-24))).astype(mm_dtype)

    # --- similarity tile on the MXU (bf16 operands, f32 accumulation) ---
    dot = lax.dot_general(fn_row[...], fn_c,
                          dimension_numbers=(((1,), (1,)), ((), ())),
                          preferred_element_type=jnp.float32)       # (TM, TN)
    # Row max of the full similarity matrix == diagonal self-similarity
    # == 1/temperature for unit-norm rows, so the reference's max subtraction
    # is exactly a constant shift (it cancels in the log-softmax anyway).
    s = (dot - 1.0) * inv_t                                         # s_ij - 1/T

    # --- fused boolean masks (no f32 mask matrices, no full MxM iota) ---
    row_ids = r * tm + lax.broadcasted_iota(jnp.int32, (tm, 1), 0)  # (TM, 1)
    col_ids = c * tn + lax.broadcasted_iota(jnp.int32, (1, tn), 1)  # (1, TN)
    not_diag = row_ids != col_ids
    col_valid = col_ids < m_actual                                  # padded cols -> 0

    a_eq = a_col_ref[...] == a_row_ref[...]                         # (TM, TN)
    p_eq = p_col_ref[...] == p_row_ref[...]
    pos_mask = a_eq & not_diag & col_valid
    fair_mask = p_eq & jnp.logical_not(a_eq) & not_diag & col_valid

    # --- per-row accumulators (exp_sum, positive count, sum of positive scores) ---
    e = jnp.exp(s)
    exp_acc[...] += jnp.sum(jnp.where(fair_mask, e, 0.0), axis=1, keepdims=True)
    lm_acc[...] += jnp.sum(pos_mask.astype(jnp.float32), axis=1, keepdims=True)
    pos_acc[...] += jnp.sum(jnp.where(pos_mask, s, 0.0), axis=1, keepdims=True)

    # --- finalize: mean positive log-prob per row, log_prob never materialized ---
    @pl.when(c == n_c - 1)
    def _finalize():
        es = jnp.maximum(exp_acc[...], 1e-9)
        lm_raw = lm_acc[...]
        lm_clamped = jnp.maximum(lm_raw, 1.0)
        mean_pos = (pos_acc[...] - lm_raw * jnp.log(es)) / lm_clamped
        valid_row = row_ids < m_actual                              # padded rows -> 0
        out_ref[...] = jnp.where(valid_row, mean_pos, 0.0)


def fscl_supcon_loss(features, labels, temperature=TEMPERATURE,
                     base_temperature=BASE_TEMPERATURE, tile=256,
                     mm_dtype=jnp.bfloat16):
    """features: (2N, D) float (native dtype); labels: (N, 2) int
    (col 0 = target, col 1 = protected)."""
    M, D = features.shape
    N = labels.shape[0]
    assert M == 2 * N, "features must have shape (2N, D)"

    if M <= 256:
        tile = _round_up(M, 8)            # single tile, minimal padding
    else:
        tile = _round_up(min(tile, 512), 128)   # lane/MXU aligned tiles
    m_pad = _round_up(M, tile)
    n_tiles = m_pad // tile

    feats = features
    if m_pad != M:
        feats = jnp.pad(feats, ((0, m_pad - M), (0, 0)))

    # .repeat(2, 2) of the NxN masks == masks built from labels tiled x2.
    a = jnp.tile(labels[:, 0].astype(jnp.int32), 2)
    p = jnp.tile(labels[:, 1].astype(jnp.int32), 2)
    if m_pad != M:
        a = jnp.pad(a, (0, m_pad - M))    # padded entries masked out in-kernel
        p = jnp.pad(p, (0, m_pad - M))
    # Row-side labels need a column layout for the broadcast compare; their
    # (TILE,1) VMEM tiles are small and only re-fetched when the row tile moves.
    a_row, a_col = a[None, :], a[:, None]
    p_row, p_col = p[None, :], p[:, None]

    kern = functools.partial(_fscl_kernel, temperature=float(temperature),
                             m_actual=M, tm=tile, tn=tile, mm_dtype=mm_dtype)

    feat_bytes = features.dtype.itemsize
    d_pad = max(_round_up(D, 128), 128)
    vmem_est = (2 * 2 * tile * d_pad * feat_bytes   # two feature operands, double-buffered
                + 4 * 2 * tile * 128 * 4            # label tiles (lane padded)
                + 2 * tile * 128 * 4                # per-row output
                + tile * d_pad * 2                  # normalized row-tile scratch
                + 3 * tile * 128 * 4                # per-row accumulators
                + 8 * tile * tile * 4)              # in-body temporaries headroom
    vmem_limit = int(min(max(vmem_est, 16 * 1024 * 1024), 64 * 1024 * 1024))

    per_row = pl.pallas_call(
        kern,
        out_shape=jax.ShapeDtypeStruct((m_pad, 1), jnp.float32),
        grid=(n_tiles, n_tiles),
        in_specs=[
            pl.BlockSpec((tile, D), lambda r, c: (r, 0)),   # row feature tile
            pl.BlockSpec((tile, D), lambda r, c: (c, 0)),   # column feature tile
            pl.BlockSpec((tile, 1), lambda r, c: (r, 0)),   # row-side target labels
            pl.BlockSpec((tile, 1), lambda r, c: (r, 0)),   # row-side protected labels
            pl.BlockSpec((1, tile), lambda r, c: (0, c)),   # col-side target labels
            pl.BlockSpec((1, tile), lambda r, c: (0, c)),   # col-side protected labels
        ],
        out_specs=pl.BlockSpec((tile, 1), lambda r, c: (r, 0)),
        scratch_shapes=[
            pltpu.VMEM((tile, D), mm_dtype),      # normalized row tile (reused over c)
            pltpu.VMEM((tile, 1), jnp.float32),   # fair-negative exp sum
            pltpu.VMEM((tile, 1), jnp.float32),   # positive-pair count
            pltpu.VMEM((tile, 1), jnp.float32),   # sum of positive shifted scores
        ],
        compiler_params=pltpu.CompilerParams(
            dimension_semantics=("parallel", "arbitrary"),
            vmem_limit_bytes=vmem_limit),
    )(feats, feats, a_col, p_col, a_row, p_row)

    # Tiny O(M) scalar reduction over per-row results.
    return -(temperature / base_temperature) * jnp.sum(per_row) / M


def fscl_supcon_loss_ref(features, labels, temperature=TEMPERATURE,
                         base_temperature=BASE_TEMPERATURE):
    """Pure-JAX reference mirroring the PyTorch forward()."""
    M = features.shape[0]
    a = jnp.tile(labels[:, 0].astype(jnp.int32), 2)
    p = jnp.tile(labels[:, 1].astype(jnp.int32), 2)
    labels_mask = (a[:, None] == a[None, :]).astype(jnp.float32)
    protected_mask = (p[:, None] == p[None, :]).astype(jnp.float32)
    eye = jnp.eye(M, dtype=jnp.float32)
    labels_mask = labels_mask * (1.0 - eye)
    f = features.astype(jnp.float32)
    fn = f / jnp.maximum(jnp.linalg.norm(f, axis=-1, keepdims=True), 1e-12)
    s = (fn @ fn.T) / temperature
    s = s - jnp.max(s, axis=1, keepdims=True)
    fair_mask = (1.0 - labels_mask) * (1.0 - eye) * protected_mask
    exp_sum = jnp.maximum(jnp.sum(jnp.exp(s) * fair_mask, axis=1, keepdims=True), 1e-9)
    log_prob = s - jnp.log(exp_sum)
    lm_sum = jnp.maximum(jnp.sum(labels_mask, axis=1), 1.0)
    mean_pos = jnp.sum(labels_mask * log_prob, axis=1) / lm_sum
    return -(temperature / base_temperature) * jnp.mean(mean_pos)


if __name__ == "__main__":
    key = jax.random.PRNGKey(0)
    k_feat, k_lab, k_prot, k_feat2, k_lab2, k_prot2 = jax.random.split(key, 6)

    # --- small primary case (single-tile path) ---
    N, D = 4, 32
    features = jax.random.normal(k_feat, (2 * N, D), dtype=jnp.float32)
    targets = jax.random.randint(k_lab, (N,), 0, 3, dtype=jnp.int32)
    protected = jax.random.randint(k_prot, (N,), 0, 2, dtype=jnp.int32)
    labels = jnp.stack([targets, protected], axis=1)                 # (N, 2)

    ref = jax.block_until_ready(fscl_supcon_loss_ref(features, labels))

    # Exactness of tiling / constant-shift / algebraic rewrite (f32 matmul path).
    loss_f32 = jax.block_until_ready(
        fscl_supcon_loss(features, labels, mm_dtype=jnp.float32))
    assert jnp.isfinite(loss_f32), "kernel produced non-finite loss"
    assert jnp.allclose(loss_f32, ref, rtol=1e-4, atol=1e-4), (loss_f32, ref)

    # Default bf16-MXU path (looser tolerance for bf16 operand rounding).
    loss = jax.block_until_ready(fscl_supcon_loss(features, labels))
    assert jnp.isfinite(loss), "kernel produced non-finite loss"
    assert jnp.allclose(loss, ref, rtol=2e-2, atol=2e-2), (loss, ref)

    # --- multi-tile + padding path: M = 336 -> tile 256, 512 padded, grid (2, 2) ---
    N2, D2 = 168, 64
    feats2 = jax.random.normal(k_feat2, (2 * N2, D2), dtype=jnp.float32)
    labels2 = jnp.stack(
        [jax.random.randint(k_lab2, (N2,), 0, 5, dtype=jnp.int32),
         jax.random.randint(k_prot2, (N2,), 0, 2, dtype=jnp.int32)], axis=1)
    ref2 = jax.block_until_ready(fscl_supcon_loss_ref(feats2, labels2))
    loss2_f32 = jax.block_until_ready(
        fscl_supcon_loss(feats2, labels2, mm_dtype=jnp.float32))
    assert jnp.allclose(loss2_f32, ref2, rtol=1e-4, atol=1e-4), (loss2_f32, ref2)
    loss2 = jax.block_until_ready(fscl_supcon_loss(feats2, labels2))
    assert jnp.allclose(loss2, ref2, rtol=2e-2, atol=2e-2), (loss2, ref2)

    print("KERNEL_OK")
</pallas_src>

<mosaic_0001>
module attributes {stable_mosaic.version = 11 : i64} {
  func.func @_fscl_kernel(%arg0: i32, %arg1: i32, %arg2: memref<8x32xf32, #tpu.memory_space<vmem>>, %arg3: memref<8x32xf32, #tpu.memory_space<vmem>>, %arg4: memref<8x1xi32, #tpu.memory_space<vmem>>, %arg5: memref<8x1xi32, #tpu.memory_space<vmem>>, %arg6: memref<1x8xi32, #tpu.memory_space<vmem>>, %arg7: memref<1x8xi32, #tpu.memory_space<vmem>>, %arg8: memref<8x1xf32, #tpu.memory_space<vmem>>, %arg9: memref<8x32xf32, #tpu.memory_space<vmem>>, %arg10: memref<8x1xf32, #tpu.memory_space<vmem>>, %arg11: memref<8x1xf32, #tpu.memory_space<vmem>>, %arg12: memref<8x1xf32, #tpu.memory_space<vmem>>) attributes {dimension_semantics = [#tpu.dimension_semantics<parallel>, #tpu.dimension_semantics<arbitrary>], iteration_bounds = array<i64: 1, 1>, scalar_prefetch = 0 : i64, scratch_operands = 4 : i64, tpu.core_type = #tpu.core_type<tc>, window_params = [{transform_indices = @transform_0, window_bounds = array<i64: 8, 32>}, {transform_indices = @transform_1, window_bounds = array<i64: 8, 32>}, {transform_indices = @transform_2, window_bounds = array<i64: 8, 1>}, {transform_indices = @transform_3, window_bounds = array<i64: 8, 1>}, {transform_indices = @transform_4, window_bounds = array<i64: 1, 8>}, {transform_indices = @transform_5, window_bounds = array<i64: 1, 8>}, {transform_indices = @transform_6, window_bounds = array<i64: 8, 1>}]} {
    %c0_i32 = arith.constant 0 : i32
    %0 = arith.cmpi eq, %arg1, %c0_i32 : i32
    %1 = arith.extui %0 : i1 to i32
    %c0_i32_0 = arith.constant 0 : i32
    %2 = arith.cmpi ne, %1, %c0_i32_0 : i32
    scf.if %2 {
      %cst_38 = arith.constant 0.000000e+00 : f32
      %74 = vector.broadcast %cst_38 : f32 to vector<8x1xf32>
      %c0_39 = arith.constant 0 : index
      %c0_40 = arith.constant 0 : index
      %75 = vector.load %arg10[%c0_39, %c0_40] : memref<8x1xf32, #tpu.memory_space<vmem>>, vector<8x1xf32>
      tpu.vector_store %arg10[%c0_39, %c0_40], %74 {strides = array<i32>} : memref<8x1xf32, #tpu.memory_space<vmem>>, vector<8x1xf32>,
      %cst_41 = arith.constant 0.000000e+00 : f32
      %76 = vector.broadcast %cst_41 : f32 to vector<8x1xf32>
      %c0_42 = arith.constant 0 : index
      %c0_43 = arith.constant 0 : index
      %77 = vector.load %arg11[%c0_42, %c0_43] : memref<8x1xf32, #tpu.memory_space<vmem>>, vector<8x1xf32>
      tpu.vector_store %arg11[%c0_42, %c0_43], %76 {strides = array<i32>} : memref<8x1xf32, #tpu.memory_space<vmem>>, vector<8x1xf32>,
      %cst_44 = arith.constant 0.000000e+00 : f32
      %78 = vector.broadcast %cst_44 : f32 to vector<8x1xf32>
      %c0_45 = arith.constant 0 : index
      %c0_46 = arith.constant 0 : index
      %79 = vector.load %arg12[%c0_45, %c0_46] : memref<8x1xf32, #tpu.memory_space<vmem>>, vector<8x1xf32>
      tpu.vector_store %arg12[%c0_45, %c0_46], %78 {strides = array<i32>} : memref<8x1xf32, #tpu.memory_space<vmem>>, vector<8x1xf32>,
      %c0_47 = arith.constant 0 : index
      %c0_48 = arith.constant 0 : index
      %80 = vector.load %arg2[%c0_47, %c0_48] : memref<8x32xf32, #tpu.memory_space<vmem>>, vector<8x32xf32>
      %81 = arith.mulf %80, %80 : vector<8x32xf32>
      %cst_49 = arith.constant dense<0.000000e+00> : vector<8xf32>
      %82 = vector.multi_reduction <add>, %81, %cst_49 [1] : vector<8x32xf32> to vector<8xf32>
      %83 = vector.shape_cast %82 : vector<8xf32> to vector<8x1xf32>
      %cst_50 = arith.constant 1.000000e-24 : f32
      %84 = vector.broadcast %cst_50 : f32 to vector<8x1xf32>
      %85 = arith.maximumf %83, %84 : vector<8x1xf32>
      %86 = math.rsqrt %85 : vector<8x1xf32>
      %87 = vector.broadcast %86 : vector<8x1xf32> to vector<8x32xf32>
      %88 = arith.mulf %80, %87 : vector<8x32xf32>
      %c0_51 = arith.constant 0 : index
      %c0_52 = arith.constant 0 : index
      %89 = vector.load %arg9[%c0_51, %c0_52] : memref<8x32xf32, #tpu.memory_space<vmem>>, vector<8x32xf32>
      tpu.vector_store %arg9[%c0_51, %c0_52], %88 {strides = array<i32>} : memref<8x32xf32, #tpu.memory_space<vmem>>, vector<8x32xf32>,
    } else {
    }
    %c0 = arith.constant 0 : index
    %c0_1 = arith.constant 0 : index
    %3 = vector.load %arg3[%c0, %c0_1] : memref<8x32xf32, #tpu.memory_space<vmem>>, vector<8x32xf32>
    %4 = arith.mulf %3, %3 : vector<8x32xf32>
    %cst = arith.constant dense<0.000000e+00> : vector<8xf32>
    %5 = vector.multi_reduction <add>, %4, %cst [1] : vector<8x32xf32> to vector<8xf32>
    %6 = vector.shape_cast %5 : vector<8xf32> to vector<8x1xf32>
    %cst_2 = arith.constant 1.000000e-24 : f32
    %7 = vector.broadcast %cst_2 : f32 to vector<8x1xf32>
    %8 = arith.maximumf %6, %7 : vector<8x1xf32>
    %9 = math.rsqrt %8 : vector<8x1xf32>
    %10 = vector.broadcast %9 : vector<8x1xf32> to vector<8x32xf32>
    %11 = arith.mulf %3, %10 : vector<8x32xf32>
    %c0_3 = arith.constant 0 : index
    %c0_4 = arith.constant 0 : index
    %12 = vector.load %arg9[%c0_3, %c0_4] : memref<8x32xf32, #tpu.memory_space<vmem>>, vector<8x32xf32>
    %cst_5 = arith.constant dense<0.000000e+00> : vector<8x8xf32>
    %13 = tpu.matmul %12, %11, %cst_5 {dimension_numbers = #tpu.dot_dimension_numbers<[1], [1], [0], [0], [0, 0, 1, 0], [], []>} : vector<8x32xf32>, vector<8x32xf32>, vector<8x8xf32> -> vector<8x8xf32>
    %cst_6 = arith.constant 1.000000e+00 : f32
    %14 = vector.broadcast %cst_6 : f32 to vector<8x8xf32>
    %15 = arith.subf %13, %14 : vector<8x8xf32>
    %cst_7 = arith.constant 1.000000e+01 : f32
    %16 = vector.broadcast %cst_7 : f32 to vector<8x8xf32>
    %17 = arith.mulf %15, %16 : vector<8x8xf32>
    %c8_i32 = arith.constant 8 : i32
    %18 = arith.muli %arg0, %c8_i32 : i32
    %19 = tpu.iota {dimensions = array<i32: 0>} : vector<8x1xi32>
    %20 = vector.broadcast %18 : i32 to vector<8x1xi32>
    %21 = arith.addi %20, %19 : vector<8x1xi32>
    %c8_i32_8 = arith.constant 8 : i32
    %22 = arith.muli %arg1, %c8_i32_8 : i32
    %23 = tpu.iota {dimensions = array<i32: 1>} : vector<1x8xi32>
    %24 = vector.broadcast %22 : i32 to vector<1x8xi32>
    %25 = arith.addi %24, %23 : vector<1x8xi32>
    %26 = vector.broadcast %21 : vector<8x1xi32> to vector<8x8xi32>
    %27 = vector.broadcast %25 : vector<1x8xi32> to vector<8x8xi32>
    %28 = arith.cmpi ne, %26, %27 : vector<8x8xi32>
    %c8_i32_9 = arith.constant 8 : i32
    %29 = vector.broadcast %c8_i32_9 : i32 to vector<1x8xi32>
    %30 = arith.cmpi slt, %25, %29 : vector<1x8xi32>
    %c0_10 = arith.constant 0 : index
    %c0_11 = arith.constant 0 : index
    %31 = vector.load %arg4[%c0_10, %c0_11] : memref<8x1xi32, #tpu.memory_space<vmem>>, vector<8x1xi32>
    %c0_12 = arith.constant 0 : index
    %c0_13 = arith.constant 0 : index
    %32 = vector.load %arg6[%c0_12, %c0_13] : memref<1x8xi32, #tpu.memory_space<vmem>>, vector<1x8xi32>
    %33 = vector.broadcast %31 : vector<8x1xi32> to vector<8x8xi32>
    %34 = vector.broadcast %32 : vector<1x8xi32> to vector<8x8xi32>
    %35 = arith.cmpi eq, %33, %34 : vector<8x8xi32>
    %c0_14 = arith.constant 0 : index
    %c0_15 = arith.constant 0 : index
    %36 = vector.load %arg5[%c0_14, %c0_15] : memref<8x1xi32, #tpu.memory_space<vmem>>, vector<8x1xi32>
    %c0_16 = arith.constant 0 : index
    %c0_17 = arith.constant 0 : index
    %37 = vector.load %arg7[%c0_16, %c0_17] : memref<1x8xi32, #tpu.memory_space<vmem>>, vector<1x8xi32>
    %38 = vector.broadcast %36 : vector<8x1xi32> to vector<8x8xi32>
    %39 = vector.broadcast %37 : vector<1x8xi32> to vector<8x8xi32>
    %40 = arith.cmpi eq, %38, %39 : vector<8x8xi32>
    %41 = arith.andi %35, %28 : vector<8x8xi1>
    %42 = vector.broadcast %30 : vector<1x8xi1> to vector<8x8xi1>
    %43 = arith.andi %41, %42 : vector<8x8xi1>
    %cst_18 = arith.constant dense<true> : vector<8x8xi1>
    %44 = arith.xori %35, %cst_18 : vector<8x8xi1>
    %45 = arith.andi %40, %44 : vector<8x8xi1>
    %46 = arith.andi %45, %28 : vector<8x8xi1>
    %47 = vector.broadcast %30 : vector<1x8xi1> to vector<8x8xi1>
    %48 = arith.andi %46, %47 : vector<8x8xi1>
    %49 = math.exp %17 : vector<8x8xf32>
    %c0_19 = arith.constant 0 : index
    %c0_20 = arith.constant 0 : index
    %50 = vector.load %arg10[%c0_19, %c0_20] : memref<8x1xf32, #tpu.memory_space<vmem>>, vector<8x1xf32>
    %cst_21 = arith.constant 0.000000e+00 : f32
    %51 = vector.broadcast %cst_21 : f32 to vector<8x8xf32>
    %52 = arith.select %48, %49, %51 : vector<8x8xi1>, vector<8x8xf32>
    %cst_22 = arith.constant dense<0.000000e+00> : vector<8xf32>
    %53 = vector.multi_reduction <add>, %52, %cst_22 [1] : vector<8x8xf32> to vector<8xf32>
    %54 = vector.shape_cast %53 : vector<8xf32> to vector<8x1xf32>
    %55 = arith.addf %50, %54 : vector<8x1xf32>
    %c0_23 = arith.constant 0 : index
    %c0_24 = arith.constant 0 : index
    %56 = vector.load %arg10[%c0_23, %c0_24] : memref<8x1xf32, #tpu.memory_space<vmem>>, vector<8x1xf32>
    tpu.vector_store %arg10[%c0_23, %c0_24], %55 {strides = array<i32>} : memref<8x1xf32, #tpu.memory_space<vmem>>, vector<8x1xf32>,
    %c0_25 = arith.constant 0 : index
    %c0_26 = arith.constant 0 : index
    %57 = vector.load %arg11[%c0_25, %c0_26] : memref<8x1xf32, #tpu.memory_space<vmem>>, vector<8x1xf32>
    %58 = arith.extui %43 : vector<8x8xi1> to vector<8x8xi32>
    %59 = arith.sitofp %58 : vector<8x8xi32> to vector<8x8xf32>
    %cst_27 = arith.constant dense<0.000000e+00> : vector<8xf32>
    %60 = vector.multi_reduction <add>, %59, %cst_27 [1] : vector<8x8xf32> to vector<8xf32>
    %61 = vector.shape_cast %60 : vector<8xf32> to vector<8x1xf32>
    %62 = arith.addf %57, %61 : vector<8x1xf32>
    %c0_28 = arith.constant 0 : index
    %c0_29 = arith.constant 0 : index
    %63 = vector.load %arg11[%c0_28, %c0_29] : memref<8x1xf32, #tpu.memory_space<vmem>>, vector<8x1xf32>
    tpu.vector_store %arg11[%c0_28, %c0_29], %62 {strides = array<i32>} : memref<8x1xf32, #tpu.memory_space<vmem>>, vector<8x1xf32>,
    %c0_30 = arith.constant 0 : index
    %c0_31 = arith.constant 0 : index
    %64 = vector.load %arg12[%c0_30, %c0_31] : memref<8x1xf32, #tpu.memory_space<vmem>>, vector<8x1xf32>
    %cst_32 = arith.constant 0.000000e+00 : f32
    %65 = vector.broadcast %cst_32 : f32 to vector<8x8xf32>
    %66 = arith.select %43, %17, %65 : vector<8x8xi1>, vector<8x8xf32>
    %cst_33 = arith.constant dense<0.000000e+00> : vector<8xf32>
    %67 = vector.multi_reduction <add>, %66, %cst_33 [1] : vector<8x8xf32> to vector<8xf32>
    %68 = vector.shape_cast %67 : vector<8xf32> to vector<8x1xf32>
    %69 = arith.addf %64, %68 : vector<8x1xf32>
    %c0_34 = arith.constant 0 : index
    %c0_35 = arith.constant 0 : index
    %70 = vector.load %arg12[%c0_34, %c0_35] : memref<8x1xf32, #tpu.memory_space<vmem>>, vector<8x1xf32>
    tpu.vector_store %arg12[%c0_34, %c0_35], %69 {strides = array<i32>} : memref<8x1xf32, #tpu.memory_space<vmem>>, vector<8x1xf32>,
    %c0_i32_36 = arith.constant 0 : i32
    %71 = arith.cmpi eq, %arg1, %c0_i32_36 : i32
    %72 = arith.extui %71 : i1 to i32
    %c0_i32_37 = arith.constant 0 : i32
    %73 = arith.cmpi ne, %72, %c0_i32_37 : i32
    scf.if %73 {
      %c0_38 = arith.constant 0 : index
      %c0_39 = arith.constant 0 : index
      %74 = vector.load %arg10[%c0_38, %c0_39] : memref<8x1xf32, #tpu.memory_space<vmem>>, vector<8x1xf32>
      %cst_40 = arith.constant 9.99999971E-10 : f32
      %75 = vector.broadcast %cst_40 : f32 to vector<8x1xf32>
      %76 = arith.maximumf %74, %75 : vector<8x1xf32>
      %c0_41 = arith.constant 0 : index
      %c0_42 = arith.constant 0 : index
      %77 = vector.load %arg11[%c0_41, %c0_42] : memref<8x1xf32, #tpu.memory_space<vmem>>, vector<8x1xf32>
      %cst_43 = arith.constant 1.000000e+00 : f32
      %78 = vector.broadcast %cst_43 : f32 to vector<8x1xf32>
      %79 = arith.maximumf %77, %78 : vector<8x1xf32>
      %c0_44 = arith.constant 0 : index
      %c0_45 = arith.constant 0 : index
      %80 = vector.load %arg12[%c0_44, %c0_45] : memref<8x1xf32, #tpu.memory_space<vmem>>, vector<8x1xf32>
      %81 = math.log %76 : vector<8x1xf32>
      %82 = arith.mulf %77, %81 : vector<8x1xf32>
      %83 = arith.subf %80, %82 : vector<8x1xf32>
      %84 = arith.divf %83, %79 : vector<8x1xf32>
      %c8_i32_46 = arith.constant 8 : i32
      %85 = vector.broadcast %c8_i32_46 : i32 to vector<8x1xi32>
      %86 = arith.cmpi slt, %21, %85 : vector<8x1xi32>
      %cst_47 = arith.constant 0.000000e+00 : f32
      %87 = vector.broadcast %cst_47 : f32 to vector<8x1xf32>
      %88 = arith.select %86, %84, %87 : vector<8x1xi1>, vector<8x1xf32>
      %c0_48 = arith.constant 0 : index
      %c0_49 = arith.constant 0 : index
      %89 = vector.load %arg8[%c0_48, %c0_49] : memref<8x1xf32, #tpu.memory_space<vmem>>, vector<8x1xf32>
      tpu.vector_store %arg8[%c0_48, %c0_49], %88 {strides = array<i32>} : memref<8x1xf32, #tpu.memory_space<vmem>>, vector<8x1xf32>,
    } else {
    }
    return
  }
  func.func @transform_0(%arg0: i32, %arg1: i32) -> (i32, i32) {
    %c0_i32 = arith.constant 0 : i32
    %c0_i32_0 = arith.constant 0 : i32
    return %arg0, %c0_i32 : i32, i32
  }
  func.func @transform_1(%arg0: i32, %arg1: i32) -> (i32, i32) {
    %c0_i32 = arith.constant 0 : i32
    %c0_i32_0 = arith.constant 0 : i32
    return %arg1, %c0_i32 : i32, i32
  }
  func.func @transform_2(%arg0: i32, %arg1: i32) -> (i32, i32) {
    %c0_i32 = arith.constant 0 : i32
    %c0_i32_0 = arith.constant 0 : i32
    return %arg0, %c0_i32 : i32, i32
  }
  func.func @transform_3(%arg0: i32, %arg1: i32) -> (i32, i32) {
    %c0_i32 = arith.constant 0 : i32
    %c0_i32_0 = arith.constant 0 : i32
    return %arg0, %c0_i32 : i32, i32
  }
  func.func @transform_4(%arg0: i32, %arg1: i32) -> (i32, i32) {
    %c0_i32 = arith.constant 0 : i32
    %c0_i32_0 = arith.constant 0 : i32
    return %c0_i32, %arg1 : i32, i32
  }
  func.func @transform_5(%arg0: i32, %arg1: i32) -> (i32, i32) {
    %c0_i32 = arith.constant 0 : i32
    %c0_i32_0 = arith.constant 0 : i32
    return %c0_i32, %arg1 : i32, i32
  }
  func.func @transform_6(%arg0: i32, %arg1: i32) -> (i32, i32) {
    %c0_i32 = arith.constant 0 : i32
    %c0_i32_0 = arith.constant 0 : i32
    return %arg0, %c0_i32 : i32, i32
  }
}

</mosaic_0001>

<bundles_post_ra>
// kernel: tpu_custom_call.1
= control target key start
LH: loop header
LB: loop body
LE: loop exit
PB: predicated region body
PF: predicated region fallthrough
CT: control target
= control target key end

     0   :  { %vm33_vm0 = vcmask 261120   ;;  %v245_v6 = vmov 0.0   ;;  %vm246_vm1 = vmmov 0   ;;  %v247_v7 = vmov 0   ;;  %s330_s0 = inlined_call_operand.vmem [shape: f32[8,32], index: 0, kind: input, shape index: {}]   ;;  %s331_s1 = inlined_call_operand.vmem [shape: f32[8,32], index: 1, kind: input, shape index: {}]   ;;  %s332_s2 = inlined_call_operand.vmem [shape: s32[8,1], index: 2, kind: input, shape index: {}]   ;;  %s333_s3 = inlined_call_operand.vmem [shape: s32[8,1], index: 3, kind: input, shape index: {}]   ;;  %s334_s4 = inlined_call_operand.vmem [shape: s32[1,8], index: 4, kind: input, shape index: {}]   ;;  %s335_s5 = inlined_call_operand.vmem [shape: s32[1,8], index: 5, kind: input, shape index: {}]   ;;  %s336_s6 = inlined_call_operand.vmem [shape: f32[8,1], index: 6, kind: output, shape index: {}]  }
   0x1   :  { %v31_v0 = vld [vmem:[%s330_s0] sm:$0xff]  ;;  %224 = vmatprep.subr.mxu0 %v245_v6  ;;  %226 = vmatprep.mubr.msk.f32.mxu0 %vm246_vm1, %v245_v6  ;;  %v130_v19 = vlaneseq  ;;  %vm173_vm7 = vcmask 64512   ;;  %vm248_vm8 = vmmov 1   ;;  %vm27_vm14 = vcmask 7168  }
   0x2   :  { %v41_v1 = vld [vmem:[%s331_s1] sm:$0xff]  ;;  %v32_v2 = vmul.f32 %v31_v0, %v31_v0  ;;  %233 = vset.pattern.permute.xlu1 %v247_v7  ;;  %234 = vset.pattern.permute.xlu0 %v247_v7  ;;  %29 = vst.msk [vmem:[#allocation4] sm:$0xff] %vm27_vm14, %v245_v6  ;;  %28 = vst.msk [vmem:[#allocation3] sm:$0xff] %vm27_vm14, %v245_v6 }
   0x3   :  { %v42_v3 = vmul.f32 %v41_v1, %v41_v1  ;;  %v141_v8 = vld [vmem:[%s332_s2] sm:$0xff]  ;;  %v131_v20 = vshrl.u32 %v130_v19, 7  ;;  %v136_v21 = vand.u32 127, %v130_v19  ;;  %30 = vst.msk [vmem:[#allocation5] sm:$0xff] %vm27_vm14, %v245_v6 }
   0x4   :  { %v34_v4 = vsel %vm33_vm0, %v32_v2, 0.0  ;;  %144 = vperm.xlu1 %233, %v141_v8   ;;  %v151_v9 = vld [vmem:[%s333_s3] sm:$0xff] }
   0x5   :  { %35 = vadd.xlane.f32.xlu0 %v34_v4  ;;  %v44_v5 = vsel %vm33_vm0, %v42_v3, 0.0  ;;  %v219_v22 = vld [vmem:[%s334_s4] ss:$0 sm:$0xff]  ;;  %vm139_vm2 = vcmp.ne.s32.totalorder %v131_v20, %v136_v21  ;;  %vm140_vm5 = vcmp.lt.s32.totalorder %v136_v21, 8 }
   0x6   :  { %v220_v27 = vld [vmem:[%s335_s5] ss:$0 sm:$0xff] }
   0x8   :  { %154 = vperm.xlu1 %233, %v151_v9  }
   0x9   :  { %45 = vadd.xlane.f32.xlu0 %v44_v5  ;;  %v180_v38 = vld [vmem:[#allocation4] sm:$0xff]  ;;  %v171_v42 = vld [vmem:[#allocation3] sm:$0xff] }
   0xa   :  { %v188_v45 = vld [vmem:[#allocation5] sm:$0xff] }
  0x83   :  { %v145_v23 = vpop.permute.xlu1 %144 }
  0x84   :  { %vm150_vm3 = vcmp.eq.s32.totalorder %v145_v23, %v219_v22 }
  0x85   :  { %vm161_vm4 = vmand %vm150_vm3, %vm139_vm2 }
  0x86   :  { %vm305_vm6 = vmand %vm161_vm4, %vm140_vm5 }
  0x87   :  { %v155_v25 = vpop.permute.xlu1 %154  ;;  %v221_v26 = vsel %vm305_vm6, 1.0, %v245_v6  ;;  %vm165_vm9 = vmxor %vm150_vm3, %vm248_vm8 }
  0x88   :  { %v183_v28 = vsel %vm173_vm7, %v221_v26, 0.0  ;;  %vm160_vm10 = vcmp.eq.s32.totalorder %v155_v25, %v220_v27 }
  0x89   :  { %184 = vadd.xlane.f32.xlu1 %v183_v28  ;;  %vm166_vm11 = vmand %vm160_vm10, %vm165_vm9 }
  0x8a   :  { %vm167_vm12 = vmand %vm166_vm11, %vm139_vm2 }
  0x8b   :  { %vm168_vm13 = vmand %vm167_vm12, %vm140_vm5 }
  0x92   :  { %v36_v10 = vpop.xlane.xlu0 %35 }
  0x93   :  { %v37_v11 = vmax.f32 %v36_v10, 1e-24 }
  0x95   :  { %235 = vrsqrt.f32 %v37_v11 }
  0x96   :  { %v46_v12 = vpop.xlane.xlu0 %45 }
  0x97   :  { %v47_v13 = vmax.f32 %v46_v12, 1e-24 }
  0x99   :  { %237 = vrsqrt.f32 %v47_v13 }
  0x9f   :  { %v236_v14 = vpop.eup %235 }
  0xa0   :  { %v39_v15 = vmul.f32 %v236_v14, %v31_v0 }
  0xa2   :  { %40 = vst.msk [vmem:[#allocation2] sm:$0xff] %vm33_vm0, %v39_v15 }
  0xa3   :  { %v238_v16 = vpop.eup %237 }
  0xa4   :  { %v49_v17 = vmul.f32 %v238_v16, %v41_v1 }
  0xa6   :  { %225 = vmatpush3.xpose.msk.msra.mxu0 %vm33_vm0, %v49_v17 }
  0xa9   :  { %v50_v18 = vld [vmem:[#allocation2] sm:$0xff] }
  0xaa   :  { %227 = vmatmul.mubr.msk.f32.vlgmr.msra.gmra.mrb[0].mxu0 %vm33_vm0, %v50_v18 }
 0x116   :  { %v185_v39 = vpop.xlane.xlu1 %184 }
 0x117   :  { %v186_v41 = vadd.f32 %v185_v39, %v180_v38 }
 0x119   :  { %187 = vst.msk [vmem:[#allocation4] sm:$0xff] %vm27_vm14, %v186_v41 }
 0x120   :  { %v200_v50 = vld [vmem:[#allocation4] sm:$0xff] }
 0x121   :  { %v201_v51 = vmax.f32 %v200_v50, 1.0 }
 0x17d   :  { %v123_v29 = vpop.f32.mrb[0].mxu0 }
 0x17e   :  { %v218_v30 = vadd.f32 -1.0, %v123_v29  ;;  %v228_v31 = vpop.f32.mrb[1].mxu0 }
 0x180   :  { %v128_v32 = vmul.f32 10.0, %v218_v30 }
 0x182   :  { %v169_v33 = vmul.f32 1.442695, %v128_v32  ;;  %v189_v37 = vsel %vm305_vm6, %v128_v32, 0.0 }
 0x183   :  { %v190_v40 = vsel %vm173_vm7, %v189_v37, 0.0 }
 0x184   :  { %239 = vpow2.f32 %v169_v33 }
 0x18e   :  { %v240_v34 = vpop.eup %239 }
 0x18f   :  { %v172_v35 = vsel %vm168_vm13, %v240_v34, 0.0 }
 0x190   :  { %v174_v36 = vsel %vm173_vm7, %v172_v35, 0.0 }
 0x191   :  { %175 = vadd.xlane.f32.xlu0 %v174_v36 }
 0x195   :  { %191 = vadd.xlane.f32.xlu0 %v190_v40 }
 0x21e   :  { %v176_v43 = vpop.xlane.xlu0 %175 }
 0x21f   :  { %v177_v44 = vadd.f32 %v176_v43, %v171_v42 }
 0x221   :  { %179 = vst.msk [vmem:[#allocation3] sm:$0xff] %vm27_vm14, %v177_v44 }
 0x222   :  { %v192_v46 = vpop.xlane.xlu0 %191 }
 0x223   :  { %v193_v47 = vadd.f32 %v192_v46, %v188_v45 }
 0x225   :  { %194 = vst.msk [vmem:[#allocation5] sm:$0xff] %vm27_vm14, %v193_v47 }
 0x228   :  { %v198_v48 = vld [vmem:[#allocation3] sm:$0xff] }
 0x229   :  { %v199_v49 = vmax.f32 %v198_v48, 1e-09 }
 0x22b   :  { %241 = vlog2.f32 %v199_v49 }
 0x22c   :  { %243 = vrcp.f32 %v201_v51  ;;  %v202_v55 = vld [vmem:[#allocation5] sm:$0xff] }
 0x235   :  { %v242_v52 = vpop.eup %241 }
 0x236   :  { %v204_v53 = vmul.f32 0.6931472, %v242_v52  ;;  %v244_v57 = vpop.eup %243 }
 0x238   :  { %v205_v54 = vmul.f32 %v204_v53, %v200_v50 }
 0x23a   :  { %v206_v56 = vsub.f32 %v202_v55, %v205_v54 }
 0x23c   :  { %v208_v58 = vmul.f32 %v244_v57, %v206_v56 }
 0x23e   :  { %211 = vst.msk [vmem:[%s336_s6] sm:$0xff] %vm27_vm14, %v208_v58 }

</bundles_post_ra>
